<compile_context>
chip_gen: v5e
topology: v5e:2x2
jax: 0.10.0
libtpu: 0.0.40
codegen_flags: <defaults>
</compile_context>

<pallas_src>
import functools

import jax
import jax.numpy as jnp
from jax.experimental import pallas as pl
from jax.experimental.pallas import tpu as pltpu


def _spatio_conv_kernel(x_ref, gk_ref, w_ref, b_ref, o_ref, xm_ref, rhs_ref,
                        *, c_in, n_route, ks_aug, t_blk):
    # x_ref  : (1, c_in, t_blk, N)          NCHW slab: one batch, t_blk time steps
    # gk_ref : (N, ks_aug*N)                [graph_kernel | I_N] (identity feeds residual)
    # w_ref  : (c_out, ks_aug*c_in)         k-major theta columns; last c_in cols = residual mix
    # b_ref  : (c_out, 1)                   theta bias (+ conv bias when c_in > c_out)
    # o_ref  : (1, c_out, t_blk*N)          lane-dense output, lane index = t*N + n
    # xm_ref : (t_blk*c_in, N)    scratch   x repacked with rows ordered (t, ci)
    # rhs_ref: (ks_aug*c_in, t_blk*N) scratch  diffusion repacked to [(k,ci), (t,n)]
    N = n_route

    # Repack x so row index = t*c_in + ci: the per-(k, t) sub-blocks of the
    # diffusion output then sit in contiguous [c_in, N] tiles.
    for t in range(t_blk):
        xm_ref[t * c_in:(t + 1) * c_in, :] = x_ref[0, :, t, :]

    # Matmul 1: graph diffusion of every (t, ci) row for every order k
    # (k = ks is the identity block -> plain x, feeding the folded residual).
    d = jnp.dot(xm_ref[...], gk_ref[...],
                preferred_element_type=jnp.float32)          # [t_blk*c_in, ks_aug*N]

    # Repack diffusion result to rows = (k, ci), lanes = (t, n) so the channel
    # mixing below is a single lane-dense matmul.
    for k in range(ks_aug):
        for t in range(t_blk):
            rhs_ref[k * c_in:(k + 1) * c_in, t * N:(t + 1) * N] = (
                d[t * c_in:(t + 1) * c_in, k * N:(k + 1) * N])

    # Matmul 2: theta mixing + residual 1x1 mix in one MXU pass; bias on the VPU.
    o = jnp.dot(w_ref[...], rhs_ref[...],
                preferred_element_type=jnp.float32) + b_ref[...]   # [c_out, t_blk*N]
    o_ref[0, :, :] = jnp.maximum(o, 0.0).astype(o_ref.dtype)


def spatio_conv_layer(x, graph_kernel, theta_w, theta_b, conv_w, conv_b, *,
                      ks, t_blk=None):
    """x: [B, c_in, T, N] -> [B, c_out, T, N] (matches SpatioConvLayer.forward)."""
    B, c_in, T, N = x.shape
    c_out = theta_w.shape[0]
    f32 = jnp.float32

    if t_blk is None:
        t_blk = T                      # whole time slab per step at these sizes
    assert T % t_blk == 0
    n_t = T // t_blk

    # Residual branch as a [c_out, c_in] mixing matrix (folded into matmul 2).
    if c_in > c_out:                   # 1x1 conv branch
        wr = conv_w.astype(f32)
        b_total = (theta_b + conv_b).reshape(c_out, 1).astype(f32)
    else:                              # identity (c_in == c_out) / zero-pad (c_in < c_out)
        wr = jnp.eye(c_out, c_in, dtype=f32)
        b_total = theta_b.reshape(c_out, 1).astype(f32)

    # Graph kernel in its native [N, ks*N] layout, plus an identity block so
    # the diffusion matmul also emits plain x for the residual.
    gk_aug = jnp.concatenate([graph_kernel.astype(f32), jnp.eye(N, dtype=f32)],
                             axis=1)                                  # [N, (ks+1)*N]

    # theta weight: native column index is ci*ks + k; reorder to k-major
    # (k*c_in + ci) and append the residual mix as the final "order" block.
    w_theta = (theta_w.astype(f32).reshape(c_out, c_in, ks)
               .transpose(0, 2, 1).reshape(c_out, ks * c_in))
    w_aug = jnp.concatenate([w_theta, wr], axis=1)                    # [c_out, (ks+1)*c_in]

    ks_aug = ks + 1
    kern = functools.partial(_spatio_conv_kernel, c_in=c_in, n_route=N,
                             ks_aug=ks_aug, t_blk=t_blk)

    out_flat = pl.pallas_call(
        kern,
        out_shape=jax.ShapeDtypeStruct((B, c_out, T * N), f32),
        grid_spec=pltpu.PrefetchScalarGridSpec(
            num_scalar_prefetch=0,
            grid=(B, n_t),
            in_specs=[
                pl.BlockSpec((1, c_in, t_blk, N), lambda b, tb: (b, 0, tb, 0)),
                pl.BlockSpec((N, ks_aug * N), lambda b, tb: (0, 0)),
                pl.BlockSpec((c_out, ks_aug * c_in), lambda b, tb: (0, 0)),
                pl.BlockSpec((c_out, 1), lambda b, tb: (0, 0)),
            ],
            out_specs=pl.BlockSpec((1, c_out, t_blk * N), lambda b, tb: (b, 0, tb)),
            scratch_shapes=[
                pltpu.VMEM((t_blk * c_in, N), f32),
                pltpu.VMEM((ks_aug * c_in, t_blk * N), f32),
            ],
        ),
        compiler_params=pltpu.CompilerParams(
            dimension_semantics=("parallel", "parallel")),
    )(x.astype(f32), gk_aug, w_aug, b_total)

    return out_flat.reshape(B, c_out, T, N)   # free reshape, NCHW preserved


def reference(x, graph_kernel, theta_w, theta_b, conv_w, conv_b, *, ks):
    """Plain-JAX transliteration of the PyTorch forward (correctness check)."""
    B, c_in, T, N = x.shape
    c_out = theta_w.shape[0]
    x_tmp = jnp.transpose(x, (0, 2, 1, 3))                            # [B,T,c_in,N]
    x_ker = jnp.matmul(x_tmp, graph_kernel)                           # [B,T,c_in,ks*N]
    x_ker = x_ker.reshape(B, T, c_in * ks, N).transpose(0, 1, 3, 2)   # [B,T,N,c_in*ks]
    x_fig = jnp.matmul(x_ker, theta_w.T) + theta_b                    # [B,T,N,c_out]
    x_gconv = jnp.transpose(x_fig, (0, 3, 1, 2))                      # [B,c_out,T,N]
    if c_in > c_out:
        x_input = jnp.einsum("oc,bctn->botn", conv_w, x) + conv_b[None, :, None, None]
    elif c_in < c_out:
        x_input = jnp.concatenate(
            [x, jnp.zeros((B, c_out - c_in, T, N), x.dtype)], axis=1)
    else:
        x_input = x
    return jnp.maximum(x_gconv + x_input, 0.0)


def _make_inputs(seed, B, c_in, c_out, T, N, ks):
    k1, k2, k3, k4, k5, k6 = jax.random.split(jax.random.PRNGKey(seed), 6)
    x = jax.random.normal(k1, (B, c_in, T, N), jnp.float32)
    graph_kernel = jax.random.normal(k2, (N, ks * N), jnp.float32) * 0.1
    theta_w = jax.random.normal(k3, (c_out, ks * c_in), jnp.float32) * 0.1
    theta_b = jax.random.normal(k4, (c_out,), jnp.float32) * 0.1
    conv_w = jax.random.normal(k5, (c_out, c_in), jnp.float32) * 0.1
    conv_b = jax.random.normal(k6, (c_out,), jnp.float32) * 0.1
    return x, graph_kernel, theta_w, theta_b, conv_w, conv_b


if __name__ == "__main__":
    B, T, N, ks = 2, 8, 16, 3
    # (c_in, c_out): identity residual, zero-pad residual, 1x1-conv residual.
    for c_in, c_out in [(4, 4), (2, 8), (8, 4)]:
        args = _make_inputs(0, B, c_in, c_out, T, N, ks)
        out = spatio_conv_layer(*args, ks=ks)
        out = jax.block_until_ready(out)
        ref = reference(*args, ks=ks)
        assert out.shape == (B, c_out, T, N)
        assert jnp.allclose(out, ref, atol=1e-5, rtol=1e-5), \
            f"mismatch vs reference for c_in={c_in}, c_out={c_out}"

    print("KERNEL_OK")
</pallas_src>

<mosaic_0001>
module attributes {stable_mosaic.version = 11 : i64} {
  func.func @_spatio_conv_kernel(%arg0: i32, %arg1: i32, %arg2: memref<1x4x8x16xf32, #tpu.memory_space<vmem>>, %arg3: memref<16x64xf32, #tpu.memory_space<vmem>>, %arg4: memref<4x16xf32, #tpu.memory_space<vmem>>, %arg5: memref<4x1xf32, #tpu.memory_space<vmem>>, %arg6: memref<1x4x128xf32, #tpu.memory_space<vmem>>, %arg7: memref<32x16xf32, #tpu.memory_space<vmem>>, %arg8: memref<16x128xf32, #tpu.memory_space<vmem>>) attributes {dimension_semantics = [#tpu.dimension_semantics<parallel>, #tpu.dimension_semantics<parallel>], iteration_bounds = array<i64: 2, 1>, scalar_prefetch = 0 : i64, scratch_operands = 2 : i64, tpu.core_type = #tpu.core_type<tc>, window_params = [{transform_indices = @transform_0, window_bounds = array<i64: 1, 4, 8, 16>}, {pipeline_mode = #tpu.pipeline_mode<synchronous>, transform_indices = @transform_1, window_bounds = array<i64: 16, 64>}, {pipeline_mode = #tpu.pipeline_mode<synchronous>, transform_indices = @transform_2, window_bounds = array<i64: 4, 16>}, {pipeline_mode = #tpu.pipeline_mode<synchronous>, transform_indices = @transform_3, window_bounds = array<i64: 4, 1>}, {transform_indices = @transform_4, window_bounds = array<i64: 1, 4, 128>}]} {
    %c0 = arith.constant 0 : index
    %c0_0 = arith.constant 0 : index
    %c0_1 = arith.constant 0 : index
    %c0_2 = arith.constant 0 : index
    %0 = vector.load %arg2[%c0, %c0_0, %c0_1, %c0_2] : memref<1x4x8x16xf32, #tpu.memory_space<vmem>>, vector<1x4x1x16xf32>
    %1 = vector.shape_cast %0 : vector<1x4x1x16xf32> to vector<4x16xf32>
    %c0_3 = arith.constant 0 : index
    %c0_4 = arith.constant 0 : index
    %2 = vector.load %arg7[%c0_3, %c0_4] : memref<32x16xf32, #tpu.memory_space<vmem>>, vector<4x16xf32>
    tpu.vector_store %arg7[%c0_3, %c0_4], %1 {strides = array<i32>} : memref<32x16xf32, #tpu.memory_space<vmem>>, vector<4x16xf32>,
    %c0_5 = arith.constant 0 : index
    %c0_6 = arith.constant 0 : index
    %c1 = arith.constant 1 : index
    %c0_7 = arith.constant 0 : index
    %3 = vector.load %arg2[%c0_5, %c0_6, %c1, %c0_7] : memref<1x4x8x16xf32, #tpu.memory_space<vmem>>, vector<1x4x1x16xf32>
    %4 = vector.shape_cast %3 : vector<1x4x1x16xf32> to vector<4x16xf32>
    %c4 = arith.constant 4 : index
    %c0_8 = arith.constant 0 : index
    %5 = vector.load %arg7[%c4, %c0_8] : memref<32x16xf32, #tpu.memory_space<vmem>>, vector<4x16xf32>
    tpu.vector_store %arg7[%c4, %c0_8], %4 {strides = array<i32>} : memref<32x16xf32, #tpu.memory_space<vmem>>, vector<4x16xf32>,
    %c0_9 = arith.constant 0 : index
    %c0_10 = arith.constant 0 : index
    %c2 = arith.constant 2 : index
    %c0_11 = arith.constant 0 : index
    %6 = vector.load %arg2[%c0_9, %c0_10, %c2, %c0_11] : memref<1x4x8x16xf32, #tpu.memory_space<vmem>>, vector<1x4x1x16xf32>
    %7 = vector.shape_cast %6 : vector<1x4x1x16xf32> to vector<4x16xf32>
    %c8 = arith.constant 8 : index
    %c0_12 = arith.constant 0 : index
    %8 = vector.load %arg7[%c8, %c0_12] : memref<32x16xf32, #tpu.memory_space<vmem>>, vector<4x16xf32>
    tpu.vector_store %arg7[%c8, %c0_12], %7 {strides = array<i32>} : memref<32x16xf32, #tpu.memory_space<vmem>>, vector<4x16xf32>,
    %c0_13 = arith.constant 0 : index
    %c0_14 = arith.constant 0 : index
    %c3 = arith.constant 3 : index
    %c0_15 = arith.constant 0 : index
    %9 = vector.load %arg2[%c0_13, %c0_14, %c3, %c0_15] : memref<1x4x8x16xf32, #tpu.memory_space<vmem>>, vector<1x4x1x16xf32>
    %10 = vector.shape_cast %9 : vector<1x4x1x16xf32> to vector<4x16xf32>
    %c12 = arith.constant 12 : index
    %c0_16 = arith.constant 0 : index
    %11 = vector.load %arg7[%c12, %c0_16] : memref<32x16xf32, #tpu.memory_space<vmem>>, vector<4x16xf32>
    tpu.vector_store %arg7[%c12, %c0_16], %10 {strides = array<i32>} : memref<32x16xf32, #tpu.memory_space<vmem>>, vector<4x16xf32>,
    %c0_17 = arith.constant 0 : index
    %c0_18 = arith.constant 0 : index
    %c4_19 = arith.constant 4 : index
    %c0_20 = arith.constant 0 : index
    %12 = vector.load %arg2[%c0_17, %c0_18, %c4_19, %c0_20] : memref<1x4x8x16xf32, #tpu.memory_space<vmem>>, vector<1x4x1x16xf32>
    %13 = vector.shape_cast %12 : vector<1x4x1x16xf32> to vector<4x16xf32>
    %c16 = arith.constant 16 : index
    %c0_21 = arith.constant 0 : index
    %14 = vector.load %arg7[%c16, %c0_21] : memref<32x16xf32, #tpu.memory_space<vmem>>, vector<4x16xf32>
    tpu.vector_store %arg7[%c16, %c0_21], %13 {strides = array<i32>} : memref<32x16xf32, #tpu.memory_space<vmem>>, vector<4x16xf32>,
    %c0_22 = arith.constant 0 : index
    %c0_23 = arith.constant 0 : index
    %c5 = arith.constant 5 : index
    %c0_24 = arith.constant 0 : index
    %15 = vector.load %arg2[%c0_22, %c0_23, %c5, %c0_24] : memref<1x4x8x16xf32, #tpu.memory_space<vmem>>, vector<1x4x1x16xf32>
    %16 = vector.shape_cast %15 : vector<1x4x1x16xf32> to vector<4x16xf32>
    %c20 = arith.constant 20 : index
    %c0_25 = arith.constant 0 : index
    %17 = vector.load %arg7[%c20, %c0_25] : memref<32x16xf32, #tpu.memory_space<vmem>>, vector<4x16xf32>
    tpu.vector_store %arg7[%c20, %c0_25], %16 {strides = array<i32>} : memref<32x16xf32, #tpu.memory_space<vmem>>, vector<4x16xf32>,
    %c0_26 = arith.constant 0 : index
    %c0_27 = arith.constant 0 : index
    %c6 = arith.constant 6 : index
    %c0_28 = arith.constant 0 : index
    %18 = vector.load %arg2[%c0_26, %c0_27, %c6, %c0_28] : memref<1x4x8x16xf32, #tpu.memory_space<vmem>>, vector<1x4x1x16xf32>
    %19 = vector.shape_cast %18 : vector<1x4x1x16xf32> to vector<4x16xf32>
    %c24 = arith.constant 24 : index
    %c0_29 = arith.constant 0 : index
    %20 = vector.load %arg7[%c24, %c0_29] : memref<32x16xf32, #tpu.memory_space<vmem>>, vector<4x16xf32>
    tpu.vector_store %arg7[%c24, %c0_29], %19 {strides = array<i32>} : memref<32x16xf32, #tpu.memory_space<vmem>>, vector<4x16xf32>,
    %c0_30 = arith.constant 0 : index
    %c0_31 = arith.constant 0 : index
    %c7 = arith.constant 7 : index
    %c0_32 = arith.constant 0 : index
    %21 = vector.load %arg2[%c0_30, %c0_31, %c7, %c0_32] : memref<1x4x8x16xf32, #tpu.memory_space<vmem>>, vector<1x4x1x16xf32>
    %22 = vector.shape_cast %21 : vector<1x4x1x16xf32> to vector<4x16xf32>
    %c28 = arith.constant 28 : index
    %c0_33 = arith.constant 0 : index
    %23 = vector.load %arg7[%c28, %c0_33] : memref<32x16xf32, #tpu.memory_space<vmem>>, vector<4x16xf32>
    tpu.vector_store %arg7[%c28, %c0_33], %22 {strides = array<i32>} : memref<32x16xf32, #tpu.memory_space<vmem>>, vector<4x16xf32>,
    %c0_34 = arith.constant 0 : index
    %c0_35 = arith.constant 0 : index
    %24 = vector.load %arg7[%c0_34, %c0_35] : memref<32x16xf32, #tpu.memory_space<vmem>>, vector<32x16xf32>
    %c0_36 = arith.constant 0 : index
    %c0_37 = arith.constant 0 : index
    %25 = vector.load %arg3[%c0_36, %c0_37] : memref<16x64xf32, #tpu.memory_space<vmem>>, vector<16x64xf32>
    %cst = arith.constant dense<0.000000e+00> : vector<32x64xf32>
    %26 = tpu.matmul %24, %25, %cst {dimension_numbers = #tpu.dot_dimension_numbers<[1], [0], [0], [1], [0, 0, 1, 1], [], []>} : vector<32x16xf32>, vector<16x64xf32>, vector<32x64xf32> -> vector<32x64xf32>
    %27 = vector.extract_strided_slice %26 {offsets = [0, 0], sizes = [4, 16], strides = [1, 1]} : vector<32x64xf32> to vector<4x16xf32>
    %c0_38 = arith.constant 0 : index
    %c0_39 = arith.constant 0 : index
    %28 = vector.load %arg8[%c0_38, %c0_39] : memref<16x128xf32, #tpu.memory_space<vmem>>, vector<4x16xf32>
    tpu.vector_store %arg8[%c0_38, %c0_39], %27 {strides = array<i32>} : memref<16x128xf32, #tpu.memory_space<vmem>>, vector<4x16xf32>,
    %29 = vector.extract_strided_slice %26 {offsets = [4, 0], sizes = [4, 16], strides = [1, 1]} : vector<32x64xf32> to vector<4x16xf32>
    %c0_40 = arith.constant 0 : index
    %c16_41 = arith.constant 16 : index
    %30 = vector.load %arg8[%c0_40, %c16_41] : memref<16x128xf32, #tpu.memory_space<vmem>>, vector<4x16xf32>
    tpu.vector_store %arg8[%c0_40, %c16_41], %29 {strides = array<i32>} : memref<16x128xf32, #tpu.memory_space<vmem>>, vector<4x16xf32>,
    %31 = vector.extract_strided_slice %26 {offsets = [8, 0], sizes = [4, 16], strides = [1, 1]} : vector<32x64xf32> to vector<4x16xf32>
    %c0_42 = arith.constant 0 : index
    %c32 = arith.constant 32 : index
    %32 = vector.load %arg8[%c0_42, %c32] : memref<16x128xf32, #tpu.memory_space<vmem>>, vector<4x16xf32>
    tpu.vector_store %arg8[%c0_42, %c32], %31 {strides = array<i32>} : memref<16x128xf32, #tpu.memory_space<vmem>>, vector<4x16xf32>,
    %33 = vector.extract_strided_slice %26 {offsets = [12, 0], sizes = [4, 16], strides = [1, 1]} : vector<32x64xf32> to vector<4x16xf32>
    %c0_43 = arith.constant 0 : index
    %c48 = arith.constant 48 : index
    %34 = vector.load %arg8[%c0_43, %c48] : memref<16x128xf32, #tpu.memory_space<vmem>>, vector<4x16xf32>
    tpu.vector_store %arg8[%c0_43, %c48], %33 {strides = array<i32>} : memref<16x128xf32, #tpu.memory_space<vmem>>, vector<4x16xf32>,
    %35 = vector.extract_strided_slice %26 {offsets = [16, 0], sizes = [4, 16], strides = [1, 1]} : vector<32x64xf32> to vector<4x16xf32>
    %c0_44 = arith.constant 0 : index
    %c64 = arith.constant 64 : index
    %36 = vector.load %arg8[%c0_44, %c64] : memref<16x128xf32, #tpu.memory_space<vmem>>, vector<4x16xf32>
    tpu.vector_store %arg8[%c0_44, %c64], %35 {strides = array<i32>} : memref<16x128xf32, #tpu.memory_space<vmem>>, vector<4x16xf32>,
    %37 = vector.extract_strided_slice %26 {offsets = [20, 0], sizes = [4, 16], strides = [1, 1]} : vector<32x64xf32> to vector<4x16xf32>
    %c0_45 = arith.constant 0 : index
    %c80 = arith.constant 80 : index
    %38 = vector.load %arg8[%c0_45, %c80] : memref<16x128xf32, #tpu.memory_space<vmem>>, vector<4x16xf32>
    tpu.vector_store %arg8[%c0_45, %c80], %37 {strides = array<i32>} : memref<16x128xf32, #tpu.memory_space<vmem>>, vector<4x16xf32>,
    %39 = vector.extract_strided_slice %26 {offsets = [24, 0], sizes = [4, 16], strides = [1, 1]} : vector<32x64xf32> to vector<4x16xf32>
    %c0_46 = arith.constant 0 : index
    %c96 = arith.constant 96 : index
    %40 = vector.load %arg8[%c0_46, %c96] : memref<16x128xf32, #tpu.memory_space<vmem>>, vector<4x16xf32>
    tpu.vector_store %arg8[%c0_46, %c96], %39 {strides = array<i32>} : memref<16x128xf32, #tpu.memory_space<vmem>>, vector<4x16xf32>,
    %41 = vector.extract_strided_slice %26 {offsets = [28, 0], sizes = [4, 16], strides = [1, 1]} : vector<32x64xf32> to vector<4x16xf32>
    %c0_47 = arith.constant 0 : index
    %c112 = arith.constant 112 : index
    %42 = vector.load %arg8[%c0_47, %c112] : memref<16x128xf32, #tpu.memory_space<vmem>>, vector<4x16xf32>
    tpu.vector_store %arg8[%c0_47, %c112], %41 {strides = array<i32>} : memref<16x128xf32, #tpu.memory_space<vmem>>, vector<4x16xf32>,
    %43 = vector.extract_strided_slice %26 {offsets = [0, 16], sizes = [4, 16], strides = [1, 1]} : vector<32x64xf32> to vector<4x16xf32>
    %c4_48 = arith.constant 4 : index
    %c0_49 = arith.constant 0 : index
    %44 = vector.load %arg8[%c4_48, %c0_49] : memref<16x128xf32, #tpu.memory_space<vmem>>, vector<4x16xf32>
    tpu.vector_store %arg8[%c4_48, %c0_49], %43 {strides = array<i32>} : memref<16x128xf32, #tpu.memory_space<vmem>>, vector<4x16xf32>,
    %45 = vector.extract_strided_slice %26 {offsets = [4, 16], sizes = [4, 16], strides = [1, 1]} : vector<32x64xf32> to vector<4x16xf32>
    %c4_50 = arith.constant 4 : index
    %c16_51 = arith.constant 16 : index
    %46 = vector.load %arg8[%c4_50, %c16_51] : memref<16x128xf32, #tpu.memory_space<vmem>>, vector<4x16xf32>
    tpu.vector_store %arg8[%c4_50, %c16_51], %45 {strides = array<i32>} : memref<16x128xf32, #tpu.memory_space<vmem>>, vector<4x16xf32>,
    %47 = vector.extract_strided_slice %26 {offsets = [8, 16], sizes = [4, 16], strides = [1, 1]} : vector<32x64xf32> to vector<4x16xf32>
    %c4_52 = arith.constant 4 : index
    %c32_53 = arith.constant 32 : index
    %48 = vector.load %arg8[%c4_52, %c32_53] : memref<16x128xf32, #tpu.memory_space<vmem>>, vector<4x16xf32>
    tpu.vector_store %arg8[%c4_52, %c32_53], %47 {strides = array<i32>} : memref<16x128xf32, #tpu.memory_space<vmem>>, vector<4x16xf32>,
    %49 = vector.extract_strided_slice %26 {offsets = [12, 16], sizes = [4, 16], strides = [1, 1]} : vector<32x64xf32> to vector<4x16xf32>
    %c4_54 = arith.constant 4 : index
    %c48_55 = arith.constant 48 : index
    %50 = vector.load %arg8[%c4_54, %c48_55] : memref<16x128xf32, #tpu.memory_space<vmem>>, vector<4x16xf32>
    tpu.vector_store %arg8[%c4_54, %c48_55], %49 {strides = array<i32>} : memref<16x128xf32, #tpu.memory_space<vmem>>, vector<4x16xf32>,
    %51 = vector.extract_strided_slice %26 {offsets = [16, 16], sizes = [4, 16], strides = [1, 1]} : vector<32x64xf32> to vector<4x16xf32>
    %c4_56 = arith.constant 4 : index
    %c64_57 = arith.constant 64 : index
    %52 = vector.load %arg8[%c4_56, %c64_57] : memref<16x128xf32, #tpu.memory_space<vmem>>, vector<4x16xf32>
    tpu.vector_store %arg8[%c4_56, %c64_57], %51 {strides = array<i32>} : memref<16x128xf32, #tpu.memory_space<vmem>>, vector<4x16xf32>,
    %53 = vector.extract_strided_slice %26 {offsets = [20, 16], sizes = [4, 16], strides = [1, 1]} : vector<32x64xf32> to vector<4x16xf32>
    %c4_58 = arith.constant 4 : index
    %c80_59 = arith.constant 80 : index
    %54 = vector.load %arg8[%c4_58, %c80_59] : memref<16x128xf32, #tpu.memory_space<vmem>>, vector<4x16xf32>
    tpu.vector_store %arg8[%c4_58, %c80_59], %53 {strides = array<i32>} : memref<16x128xf32, #tpu.memory_space<vmem>>, vector<4x16xf32>,
    %55 = vector.extract_strided_slice %26 {offsets = [24, 16], sizes = [4, 16], strides = [1, 1]} : vector<32x64xf32> to vector<4x16xf32>
    %c4_60 = arith.constant 4 : index
    %c96_61 = arith.constant 96 : index
    %56 = vector.load %arg8[%c4_60, %c96_61] : memref<16x128xf32, #tpu.memory_space<vmem>>, vector<4x16xf32>
    tpu.vector_store %arg8[%c4_60, %c96_61], %55 {strides = array<i32>} : memref<16x128xf32, #tpu.memory_space<vmem>>, vector<4x16xf32>,
    %57 = vector.extract_strided_slice %26 {offsets = [28, 16], sizes = [4, 16], strides = [1, 1]} : vector<32x64xf32> to vector<4x16xf32>
    %c4_62 = arith.constant 4 : index
    %c112_63 = arith.constant 112 : index
    %58 = vector.load %arg8[%c4_62, %c112_63] : memref<16x128xf32, #tpu.memory_space<vmem>>, vector<4x16xf32>
    tpu.vector_store %arg8[%c4_62, %c112_63], %57 {strides = array<i32>} : memref<16x128xf32, #tpu.memory_space<vmem>>, vector<4x16xf32>,
    %59 = vector.extract_strided_slice %26 {offsets = [0, 32], sizes = [4, 16], strides = [1, 1]} : vector<32x64xf32> to vector<4x16xf32>
    %c8_64 = arith.constant 8 : index
    %c0_65 = arith.constant 0 : index
    %60 = vector.load %arg8[%c8_64, %c0_65] : memref<16x128xf32, #tpu.memory_space<vmem>>, vector<4x16xf32>
    tpu.vector_store %arg8[%c8_64, %c0_65], %59 {strides = array<i32>} : memref<16x128xf32, #tpu.memory_space<vmem>>, vector<4x16xf32>,
    %61 = vector.extract_strided_slice %26 {offsets = [4, 32], sizes = [4, 16], strides = [1, 1]} : vector<32x64xf32> to vector<4x16xf32>
    %c8_66 = arith.constant 8 : index
    %c16_67 = arith.constant 16 : index
    %62 = vector.load %arg8[%c8_66, %c16_67] : memref<16x128xf32, #tpu.memory_space<vmem>>, vector<4x16xf32>
    tpu.vector_store %arg8[%c8_66, %c16_67], %61 {strides = array<i32>} : memref<16x128xf32, #tpu.memory_space<vmem>>, vector<4x16xf32>,
    %63 = vector.extract_strided_slice %26 {offsets = [8, 32], sizes = [4, 16], strides = [1, 1]} : vector<32x64xf32> to vector<4x16xf32>
    %c8_68 = arith.constant 8 : index
    %c32_69 = arith.constant 32 : index
    %64 = vector.load %arg8[%c8_68, %c32_69] : memref<16x128xf32, #tpu.memory_space<vmem>>, vector<4x16xf32>
    tpu.vector_store %arg8[%c8_68, %c32_69], %63 {strides = array<i32>} : memref<16x128xf32, #tpu.memory_space<vmem>>, vector<4x16xf32>,
    %65 = vector.extract_strided_slice %26 {offsets = [12, 32], sizes = [4, 16], strides = [1, 1]} : vector<32x64xf32> to vector<4x16xf32>
    %c8_70 = arith.constant 8 : index
    %c48_71 = arith.constant 48 : index
    %66 = vector.load %arg8[%c8_70, %c48_71] : memref<16x128xf32, #tpu.memory_space<vmem>>, vector<4x16xf32>
    tpu.vector_store %arg8[%c8_70, %c48_71], %65 {strides = array<i32>} : memref<16x128xf32, #tpu.memory_space<vmem>>, vector<4x16xf32>,
    %67 = vector.extract_strided_slice %26 {offsets = [16, 32], sizes = [4, 16], strides = [1, 1]} : vector<32x64xf32> to vector<4x16xf32>
    %c8_72 = arith.constant 8 : index
    %c64_73 = arith.constant 64 : index
    %68 = vector.load %arg8[%c8_72, %c64_73] : memref<16x128xf32, #tpu.memory_space<vmem>>, vector<4x16xf32>
    tpu.vector_store %arg8[%c8_72, %c64_73], %67 {strides = array<i32>} : memref<16x128xf32, #tpu.memory_space<vmem>>, vector<4x16xf32>,
    %69 = vector.extract_strided_slice %26 {offsets = [20, 32], sizes = [4, 16], strides = [1, 1]} : vector<32x64xf32> to vector<4x16xf32>
    %c8_74 = arith.constant 8 : index
    %c80_75 = arith.constant 80 : index
    %70 = vector.load %arg8[%c8_74, %c80_75] : memref<16x128xf32, #tpu.memory_space<vmem>>, vector<4x16xf32>
    tpu.vector_store %arg8[%c8_74, %c80_75], %69 {strides = array<i32>} : memref<16x128xf32, #tpu.memory_space<vmem>>, vector<4x16xf32>,
    %71 = vector.extract_strided_slice %26 {offsets = [24, 32], sizes = [4, 16], strides = [1, 1]} : vector<32x64xf32> to vector<4x16xf32>
    %c8_76 = arith.constant 8 : index
    %c96_77 = arith.constant 96 : index
    %72 = vector.load %arg8[%c8_76, %c96_77] : memref<16x128xf32, #tpu.memory_space<vmem>>, vector<4x16xf32>
    tpu.vector_store %arg8[%c8_76, %c96_77], %71 {strides = array<i32>} : memref<16x128xf32, #tpu.memory_space<vmem>>, vector<4x16xf32>,
    %73 = vector.extract_strided_slice %26 {offsets = [28, 32], sizes = [4, 16], strides = [1, 1]} : vector<32x64xf32> to vector<4x16xf32>
    %c8_78 = arith.constant 8 : index
    %c112_79 = arith.constant 112 : index
    %74 = vector.load %arg8[%c8_78, %c112_79] : memref<16x128xf32, #tpu.memory_space<vmem>>, vector<4x16xf32>
    tpu.vector_store %arg8[%c8_78, %c112_79], %73 {strides = array<i32>} : memref<16x128xf32, #tpu.memory_space<vmem>>, vector<4x16xf32>,
    %75 = vector.extract_strided_slice %26 {offsets = [0, 48], sizes = [4, 16], strides = [1, 1]} : vector<32x64xf32> to vector<4x16xf32>
    %c12_80 = arith.constant 12 : index
    %c0_81 = arith.constant 0 : index
    %76 = vector.load %arg8[%c12_80, %c0_81] : memref<16x128xf32, #tpu.memory_space<vmem>>, vector<4x16xf32>
    tpu.vector_store %arg8[%c12_80, %c0_81], %75 {strides = array<i32>} : memref<16x128xf32, #tpu.memory_space<vmem>>, vector<4x16xf32>,
    %77 = vector.extract_strided_slice %26 {offsets = [4, 48], sizes = [4, 16], strides = [1, 1]} : vector<32x64xf32> to vector<4x16xf32>
    %c12_82 = arith.constant 12 : index
    %c16_83 = arith.constant 16 : index
    %78 = vector.load %arg8[%c12_82, %c16_83] : memref<16x128xf32, #tpu.memory_space<vmem>>, vector<4x16xf32>
    tpu.vector_store %arg8[%c12_82, %c16_83], %77 {strides = array<i32>} : memref<16x128xf32, #tpu.memory_space<vmem>>, vector<4x16xf32>,
    %79 = vector.extract_strided_slice %26 {offsets = [8, 48], sizes = [4, 16], strides = [1, 1]} : vector<32x64xf32> to vector<4x16xf32>
    %c12_84 = arith.constant 12 : index
    %c32_85 = arith.constant 32 : index
    %80 = vector.load %arg8[%c12_84, %c32_85] : memref<16x128xf32, #tpu.memory_space<vmem>>, vector<4x16xf32>
    tpu.vector_store %arg8[%c12_84, %c32_85], %79 {strides = array<i32>} : memref<16x128xf32, #tpu.memory_space<vmem>>, vector<4x16xf32>,
    %81 = vector.extract_strided_slice %26 {offsets = [12, 48], sizes = [4, 16], strides = [1, 1]} : vector<32x64xf32> to vector<4x16xf32>
    %c12_86 = arith.constant 12 : index
    %c48_87 = arith.constant 48 : index
    %82 = vector.load %arg8[%c12_86, %c48_87] : memref<16x128xf32, #tpu.memory_space<vmem>>, vector<4x16xf32>
    tpu.vector_store %arg8[%c12_86, %c48_87], %81 {strides = array<i32>} : memref<16x128xf32, #tpu.memory_space<vmem>>, vector<4x16xf32>,
    %83 = vector.extract_strided_slice %26 {offsets = [16, 48], sizes = [4, 16], strides = [1, 1]} : vector<32x64xf32> to vector<4x16xf32>
    %c12_88 = arith.constant 12 : index
    %c64_89 = arith.constant 64 : index
    %84 = vector.load %arg8[%c12_88, %c64_89] : memref<16x128xf32, #tpu.memory_space<vmem>>, vector<4x16xf32>
    tpu.vector_store %arg8[%c12_88, %c64_89], %83 {strides = array<i32>} : memref<16x128xf32, #tpu.memory_space<vmem>>, vector<4x16xf32>,
    %85 = vector.extract_strided_slice %26 {offsets = [20, 48], sizes = [4, 16], strides = [1, 1]} : vector<32x64xf32> to vector<4x16xf32>
    %c12_90 = arith.constant 12 : index
    %c80_91 = arith.constant 80 : index
    %86 = vector.load %arg8[%c12_90, %c80_91] : memref<16x128xf32, #tpu.memory_space<vmem>>, vector<4x16xf32>
    tpu.vector_store %arg8[%c12_90, %c80_91], %85 {strides = array<i32>} : memref<16x128xf32, #tpu.memory_space<vmem>>, vector<4x16xf32>,
    %87 = vector.extract_strided_slice %26 {offsets = [24, 48], sizes = [4, 16], strides = [1, 1]} : vector<32x64xf32> to vector<4x16xf32>
    %c12_92 = arith.constant 12 : index
    %c96_93 = arith.constant 96 : index
    %88 = vector.load %arg8[%c12_92, %c96_93] : memref<16x128xf32, #tpu.memory_space<vmem>>, vector<4x16xf32>
    tpu.vector_store %arg8[%c12_92, %c96_93], %87 {strides = array<i32>} : memref<16x128xf32, #tpu.memory_space<vmem>>, vector<4x16xf32>,
    %89 = vector.extract_strided_slice %26 {offsets = [28, 48], sizes = [4, 16], strides = [1, 1]} : vector<32x64xf32> to vector<4x16xf32>
    %c12_94 = arith.constant 12 : index
    %c112_95 = arith.constant 112 : index
    %90 = vector.load %arg8[%c12_94, %c112_95] : memref<16x128xf32, #tpu.memory_space<vmem>>, vector<4x16xf32>
    tpu.vector_store %arg8[%c12_94, %c112_95], %89 {strides = array<i32>} : memref<16x128xf32, #tpu.memory_space<vmem>>, vector<4x16xf32>,
    %c0_96 = arith.constant 0 : index
    %c0_97 = arith.constant 0 : index
    %91 = vector.load %arg4[%c0_96, %c0_97] : memref<4x16xf32, #tpu.memory_space<vmem>>, vector<4x16xf32>
    %c0_98 = arith.constant 0 : index
    %c0_99 = arith.constant 0 : index
    %92 = vector.load %arg8[%c0_98, %c0_99] : memref<16x128xf32, #tpu.memory_space<vmem>>, vector<16x128xf32>
    %cst_100 = arith.constant dense<0.000000e+00> : vector<4x128xf32>
    %93 = tpu.matmul %91, %92, %cst_100 {dimension_numbers = #tpu.dot_dimension_numbers<[1], [0], [0], [1], [0, 0, 1, 1], [], []>} : vector<4x16xf32>, vector<16x128xf32>, vector<4x128xf32> -> vector<4x128xf32>
    %c0_101 = arith.constant 0 : index
    %c0_102 = arith.constant 0 : index
    %94 = vector.load %arg5[%c0_101, %c0_102] : memref<4x1xf32, #tpu.memory_space<vmem>>, vector<4x1xf32>
    %95 = vector.broadcast %94 : vector<4x1xf32> to vector<4x128xf32>
    %96 = arith.addf %93, %95 : vector<4x128xf32>
    %cst_103 = arith.constant 0.000000e+00 : f32
    %97 = vector.broadcast %cst_103 : f32 to vector<4x128xf32>
    %98 = arith.maximumf %96, %97 : vector<4x128xf32>
    %c0_104 = arith.constant 0 : index
    %c0_105 = arith.constant 0 : index
    %c0_106 = arith.constant 0 : index
    %99 = vector.load %arg6[%c0_104, %c0_105, %c0_106] : memref<1x4x128xf32, #tpu.memory_space<vmem>>, vector<1x4x128xf32>
    %100 = vector.shape_cast %99 : vector<1x4x128xf32> to vector<4x128xf32>
    %101 = vector.shape_cast %98 : vector<4x128xf32> to vector<1x4x128xf32>
    tpu.vector_store %arg6[%c0_104, %c0_105, %c0_106], %101 {strides = array<i32>} : memref<1x4x128xf32, #tpu.memory_space<vmem>>, vector<1x4x128xf32>,
    return
  }
  func.func @transform_0(%arg0: i32, %arg1: i32) -> (i32, i32, i32, i32) {
    %c0_i32 = arith.constant 0 : i32
    %c0_i32_0 = arith.constant 0 : i32
    %c0_i32_1 = arith.constant 0 : i32
    return %arg0, %c0_i32, %arg1, %c0_i32_0 : i32, i32, i32, i32
  }
  func.func @transform_1(%arg0: i32, %arg1: i32) -> (i32, i32) {
    %c0_i32 = arith.constant 0 : i32
    %c0_i32_0 = arith.constant 0 : i32
    %c0_i32_1 = arith.constant 0 : i32
    return %c0_i32, %c0_i32_0 : i32, i32
  }
  func.func @transform_2(%arg0: i32, %arg1: i32) -> (i32, i32) {
    %c0_i32 = arith.constant 0 : i32
    %c0_i32_0 = arith.constant 0 : i32
    %c0_i32_1 = arith.constant 0 : i32
    return %c0_i32, %c0_i32_0 : i32, i32
  }
  func.func @transform_3(%arg0: i32, %arg1: i32) -> (i32, i32) {
    %c0_i32 = arith.constant 0 : i32
    %c0_i32_0 = arith.constant 0 : i32
    %c0_i32_1 = arith.constant 0 : i32
    return %c0_i32, %c0_i32_0 : i32, i32
  }
  func.func @transform_4(%arg0: i32, %arg1: i32) -> (i32, i32, i32) {
    %c0_i32 = arith.constant 0 : i32
    %c0_i32_0 = arith.constant 0 : i32
    return %arg0, %c0_i32, %arg1 : i32, i32, i32
  }
}

</mosaic_0001>

<bundles_post_ra>
// kernel: tpu_custom_call.1
= control target key start
LH: loop header
LB: loop body
LE: loop exit
PB: predicated region body
PF: predicated region fallthrough
CT: control target
= control target key end

     0   :  { %s1230_s0 = inlined_call_operand.hbm [shape: f32[2,4,8,16], index: 0, kind: input, shape index: {}]   ;;  %s1231_s1 = inlined_call_operand.hbm [shape: f32[16,64], index: 1, kind: input, shape index: {}]   ;;  %s1232_s2 = inlined_call_operand.vmem [shape: f32[4,16], index: 2, kind: input, shape index: {}]   ;;  %s1233_s3 = inlined_call_operand.vmem [shape: f32[4,1], index: 3, kind: input, shape index: {}]   ;;  %s1234_s4 = inlined_call_operand.hbm [shape: f32[2,4,128], index: 4, kind: output, shape index: {}]  }
   0x1   :  { %1238 = sst [smem:[#allocation14_spill]] %s1231_s1 }
   0x2   :  { %9 = vsyncpa [#allocation5], 0 }
   0x3   :  { %11 = vsyncpa [#allocation5 + $0x1], 0 }
   0x4   :  { %12 = vsyncpa [#allocation8], 0 }
   0x5   :  { %13 = vsyncpa [#allocation6], 0 }
   0x6   :  { %15 = vsyncpa [#allocation6 + $0x1], 0  ;;  %s965_s15 = smov 0   ;;  %s967_s16 = smov 0  }
   0x7   :  { %s969_s17 = smov 0   ;;  %s971_s18 = smov 0  }
   0x8   :  { %s973_s19 = smov 0   ;;  %s975_s20 = smov 0  }
   0x9 LB: > { %s671_s21 = sadd.s32 4294967295, %s927_s20   ;;  %s672_s22 = sadd.s32 4294967294, %s927_s20   ;;  %s927_s20 = sphi %s975_s20, %s21_s20   ;;  %s923_s19 = sphi %s973_s19, %s1255_s19   ;;  %s919_s18 = sphi %s971_s18, %s1254_s18   ;;  %s915_s17 = sphi %s969_s17, %s1253_s17   ;;  %s911_s16 = sphi %s967_s16, %s1252_s16   ;;  %s907_s15 = sphi %s965_s15, %s1251_s15  }
   0xa   : > { %p55_p0 = scmp.ne.s32.totalorder %s911_s16, %s907_s15  ;;  %p999_p1 = scmp.eq.s32.totalorder %s671_s21, 0 }
   0xb   : > { %p1003_p2 = scmp.eq.s32.totalorder %s671_s21, 1  ;;  %p150_p3 = scmp.eq.s32.totalorder %s672_s22, 1 }
   0xc   : > { %p1009_p4 = por %p999_p1, %p55_p0  ;;  %p673_p5 = scmp.ge.s32.totalorder %s927_s20, 1 }
   0xd   : > { %p1014_p6 = por %p150_p3, %p55_p0  ;;  %p157_p7 = scmp.lt.s32.totalorder %s927_s20, 3 }
   0xe   : > { %s1243_s1 = sld [smem:[#allocation14_spill]]  ;;  %s929_s5 = smov [#allocation7]  }
   0xf   : > { %p1022_p8 = pnand %p673_p5, %p157_p7  ;;  %s170_s6 = sshll.u32 %s929_s5, 4  ;;  %s171_s6 = int_to_ptr.vmem [resolvable:$true] %s170_s6 }
  0x10   : > { %p675_p11 = scmp.ge.s32.totalorder %s927_s20, 2  ;;  %s1235_s7 = smov 128  }
  0x11   : > { %p705_p9 = pneg %p1022_p8  ;;  %s1236_s8 = smov 8  }
  0x12   : > { %s33_s9 = sadd.s32 1, %s923_s19  ;;  %s42_s10 = sadd.s32 1, %s915_s17 }
  0x13   : > { %p706_p10 = pnand %p705_p9, %p999_p1  ;;  %p35_p12 = scmp.ge.s32.totalorder %s33_s9, 2 }
  0x14   : > { %s168_s29 = sshll.u32 %s1243_s1, 4  ;;  %p49_p13 = scmp.ne.s32.totalorder %s915_s17, %s911_s16  ;;  %s169_s29 = int_to_ptr.hbm [resolvable:$true] %s168_s29 }
  0x15   : > { %708 = dma.hbm_to_vmem [thread:$0]  (!%p706_p10), %s169_s29, 256, %s171_s6, [#allocation8], %s1235_s7, %s1235_s7, %s1236_s8  }
  0x16   : > { %p50_p0 = scmp.eq.s32.totalorder %s927_s20, 0  ;;  %s1257_s9 = smov (%p35_p12, %s33_s9), 0 }
  0x17   : > { %1245 = sst [smem:[#allocation13_spill]] %s1257_s9  ;;  %p1047_p5 = por %p1003_p2, %p49_p13 }
  0x18   : > { %p1041_p3 = por %p50_p0, %p49_p13  ;;  %s37_s13 = ssub.s32 %s923_s19, %s1257_s9 }
  0x19   : > { %p718_p7 = scmp.lt.s32.totalorder %s927_s20, 2  ;;  %p40_p9 = scmp.eq.s32.totalorder %s37_s13, 0 }
  0x1a   : > { %s190_s14 = sand.u32 1, %s915_s17   ;;  %s692_s27 = sshll.u32 %s923_s19, 5 }
  0x1b   : > { %s676_s21 = sshll.u32 %s190_s14, 5  ;;  %s200_s5 = scalar_lea.hbm %s1230_s0, %s692_s27 }
  0x1c   : > { %s1056_s22 = scalar_select %p40_p9, %s915_s17, %s42_s10  }
  0x1d   : > { %s194_s6 = scalar_lea.vmem [#allocation4], %s676_s21  ;;  %s201_s24 = sshll.u32 %s200_s5, 4  ;;  %s202_s24 = int_to_ptr.hbm [resolvable:$true] %s201_s24 }
  0x1e   : > { %s203_s7 = sshll.u32 %s194_s6, 4  ;;  %p710_p2 = pnand %p718_p7, %p1041_p3  ;;  %s204_s7 = int_to_ptr.vmem [resolvable:$true] %s203_s7 }
  0x1f   : > { %s191_s8 = scalar_lea.sflag [#allocation5], %s190_s14  ;;  %s1248_s1 = smov 8  }
  0x20   : > { %s1249_s9 = smov 128   ;;  %215 = sbr.rel (%p1022_p8) target bundleno = 489 (0x1e9), region = 36 }
  0x21   : > { %712 = dma.hbm_to_vmem [thread:$0]  (!%p710_p2), %s202_s24, 512, %s204_s7, %s191_s8, %s1249_s9, %s1249_s9, %s1248_s1  }
  0x22   : > { %s1070_s10 = sand.u32 (!%p1022_p8), 1, %s911_s16  }
  0x23   : > { %s680_s13 = sshll.u32 (!%p1022_p8), %s1070_s10, 5  ;;  %s218_s21 = scalar_lea.sflag (!%p1022_p8), [#allocation5], %s1070_s10 }
  0x24   : > { %s1074_s27 = scalar_lea.vmem (!%p1022_p8), [#allocation4], %s680_s13 }
  0x25   : > { %894 = dma.done.wait (%p1009_p4), %s218_s21, 512  }
  0x26   : > { %896 = vsyncadd (%p1009_p4), %s218_s21, 4294966784 }
  0x27   : > { %898 = dma.done.wait (%p999_p1), [#allocation8], 256  }
  0x28   : > { %900 = vsyncadd (%p999_p1), [#allocation8], 4294967040  ;;  %vm261_vm0 = vcmask 1041409   ;;  %v389_v0 = vld [vmem:[#allocation7 + $0x8] sm:$0xff]  ;;  %v388_v1 = vld [vmem:[#allocation7] sm:$0xff]  ;;  %vm264_vm1 = vcmask 1042434  }
  0x29   : > { %v252_v2 = vld [vmem:[%s1074_s27] sm:$0x1]  ;;  %vm267_vm2 = vcmask 1043459   ;;  %417 = vmatpush.msra.mxu0 %v389_v0  ;;  %693 = vmatpush.msra.mxu2 %v389_v0  ;;  %v253_v3 = vld [vmem:[%s1074_s27 + $0x8] sm:$0x1]  ;;  %vm270_vm3 = vcmask 125952  }
  0x2a   : > { %v254_v4 = vld [vmem:[%s1074_s27 + $0x10] sm:$0x1]  ;;  %v255_v5 = vld [vmem:[%s1074_s27 + $0x18] sm:$0x1]  ;;  %v260_v6 = vrot.slane %v253_v3, 7  ;;  %694 = vmatpush.msra.mxu3 %v389_v0  ;;  %vm390_vm4 = vcmask 130048  }
  0x2b   : > { %v263_v7 = vrot.slane %v254_v4, 6  ;;  %v266_v8 = vrot.slane %v255_v5, 5  ;;  %v272_v9 = vld [vmem:[%s1074_s27 + $0x1] sm:$0x1]  ;;  %418 = vmatpush.msra.mxu0 %v388_v1  ;;  %v273_v10 = vld [vmem:[%s1074_s27 + $0x9] sm:$0x1]  ;;  %695 = vmatpush.msra.mxu2 %v388_v1 }
  0x2c   : > { %v274_v11 = vld [vmem:[%s1074_s27 + $0x11] sm:$0x1]  ;;  %v275_v12 = vld [vmem:[%s1074_s27 + $0x19] sm:$0x1]  ;;  %v262_v13 = vsel %vm261_vm0, %v260_v6, %v252_v2  ;;  %v280_v14 = vrot.slane %v273_v10, 7  ;;  %696 = vmatpush.msra.mxu3 %v388_v1  ;;  %s932_s1 = smov 16  }
  0x2d   : > { %v282_v15 = vrot.slane %v274_v11, 6  ;;  %v284_v16 = vrot.slane %v275_v12, 5  ;;  %v288_v17 = vld [vmem:[%s1074_s27 + $0x2] sm:$0x1]  ;;  %v265_v18 = vsel %vm264_vm1, %v263_v7, %v262_v13  ;;  %v289_v19 = vld [vmem:[%s1074_s27 + $0xa] sm:$0x1] }
  0x2e   : > { %v290_v20 = vld [vmem:[%s1074_s27 + $0x12] sm:$0x1]  ;;  %v291_v21 = vld [vmem:[%s1074_s27 + $0x1a] sm:$0x1]  ;;  %v268_v22 = vsel %vm267_vm2, %v266_v8, %v265_v18  ;;  %v281_v23 = vsel %vm261_vm0, %v280_v14, %v272_v9  ;;  %v296_v24 = vrot.slane %v289_v19, 7  ;;  %s933_s23 = smov 112  }
  0x2f   : > { %v298_v25 = vrot.slane %v290_v20, 6  ;;  %v304_v26 = vld [vmem:[%s1074_s27 + $0x3] sm:$0x1]  ;;  %v305_v27 = vld [vmem:[%s1074_s27 + $0xb] sm:$0x1]  ;;  %v283_v28 = vsel %vm264_vm1, %v282_v15, %v281_v23  ;;  %v300_v29 = vrot.slane %v291_v21, 5 }
  0x30   : > { %271 = vst.msk [vmem:[#allocation2] sm:$0xf] %vm270_vm3, %v268_v22  ;;  %v306_v30 = vld [vmem:[%s1074_s27 + $0x13] sm:$0x1]  ;;  %v312_v31 = vrot.slane %v305_v27, 7  ;;  %v285_v32 = vsel %vm267_vm2, %v284_v16, %v283_v28  ;;  %v297_v33 = vsel %vm261_vm0, %v296_v24, %v288_v17  ;;  %s934_s25 = smov 96  }
  0x31   : > { %v307_v34 = vld [vmem:[%s1074_s27 + $0x1b] sm:$0x1]  ;;  %v314_v35 = vrot.slane %v306_v30, 6  ;;  %v320_v36 = vld [vmem:[%s1074_s27 + $0x4] sm:$0x1]  ;;  %v299_v37 = vsel %vm264_vm1, %v298_v25, %v297_v33  ;;  %s935_s30 = smov 80  }
  0x32   : > { %287 = vst.msk [vmem:[#allocation2 + $0x4] sm:$0xf] %vm270_vm3, %v285_v32  ;;  %v313_v38 = vsel %vm261_vm0, %v312_v31, %v304_v26  ;;  %v316_v39 = vrot.slane %v307_v34, 5  ;;  %v321_v40 = vld [vmem:[%s1074_s27 + $0xc] sm:$0x1]  ;;  %v301_v41 = vsel %vm267_vm2, %v300_v29, %v299_v37  ;;  %s936_s7 = smov 32  }
  0x33   : > { %v315_v42 = vsel %vm264_vm1, %v314_v35, %v313_v38  ;;  %v322_v43 = vld [vmem:[%s1074_s27 + $0x14] sm:$0x1]  ;;  %v323_v44 = vld [vmem:[%s1074_s27 + $0x1c] sm:$0x1]  ;;  %v328_v45 = vrot.slane %v321_v40, 7  ;;  %s937_s8 = smov 48  }
  0x34   : > { %303 = vst.msk [vmem:[#allocation2 + $0x8] sm:$0xf] %vm270_vm3, %v301_v41  ;;  %v317_v46 = vsel %vm267_vm2, %v316_v39, %v315_v42  ;;  %v330_v47 = vrot.slane %v322_v43, 6  ;;  %v332_v48 = vrot.slane %v323_v44, 5  ;;  %v336_v49 = vld [vmem:[%s1074_s27 + $0x5] sm:$0x1] }
  0x35   : > { %319 = vst.msk [vmem:[#allocation2 + $0xc] sm:$0xf] %vm270_vm3, %v317_v46  ;;  %v329_v50 = vsel %vm261_vm0, %v328_v45, %v320_v36  ;;  %v337_v51 = vld [vmem:[%s1074_s27 + $0xd] sm:$0x1]  ;;  %v338_v52 = vld [vmem:[%s1074_s27 + $0x15] sm:$0x1] }
  0x36   : > { %v331_v53 = vsel %vm264_vm1, %v330_v47, %v329_v50  ;;  %v339_v54 = vld [vmem:[%s1074_s27 + $0x1d] sm:$0x1]  ;;  %v344_v55 = vrot.slane %v337_v51, 7  ;;  %v346_v56 = vrot.slane %v338_v52, 6  ;;  %v352_v57 = vld [vmem:[%s1074_s27 + $0x6] sm:$0x1] }
  0x37   : > { %v333_v58 = vsel %vm267_vm2, %v332_v48, %v331_v53  ;;  %v348_v59 = vrot.slane %v339_v54, 5  ;;  %v353_v60 = vld [vmem:[%s1074_s27 + $0xe] sm:$0x1]  ;;  %v354_v61 = vld [vmem:[%s1074_s27 + $0x16] sm:$0x1]  ;;  %s938_s9 = smov 64  }
  0x38   : > { %335 = vst.msk [vmem:[#allocation2 + $0x10] sm:$0xf] %vm270_vm3, %v333_v58  ;;  %v345_v62 = vsel %vm261_vm0, %v344_v55, %v336_v49  ;;  %v355_v63 = vld [vmem:[%s1074_s27 + $0x1e] sm:$0x1]  ;;  %v360_v0 = vrot.slane %v353_v60, 7  ;;  %v362_v1 = vrot.slane %v354_v61, 6 }
  0x39   : > { %v384_v2 = vld [vmem:[#allocation2] sm:$0xff]  ;;  %v347_v3 = vsel %vm264_vm1, %v346_v56, %v345_v62  ;;  %v364_v4 = vrot.slane %v355_v63, 5  ;;  %v368_v5 = vld [vmem:[%s1074_s27 + $0x7] sm:$0x1]  ;;  %v369_v6 = vld [vmem:[%s1074_s27 + $0xf] sm:$0x1] }
  0x3a   : > { %683 = vmatmul.msk.f32.vlgmr.msra.gmra.mxu0 %vm390_vm4, %v384_v2  ;;  %v349_v7 = vsel %vm267_vm2, %v348_v59, %v347_v3  ;;  %v361_v8 = vsel %vm261_vm0, %v360_v0, %v352_v57  ;;  %v370_v9 = vld [vmem:[%s1074_s27 + $0x17] sm:$0x1]  ;;  %v371_v10 = vld [vmem:[%s1074_s27 + $0x1f] sm:$0x1]  ;;  %v376_v11 = vrot.slane %v369_v6, 7  ;;  %vm437_vm5 = vcmask 261252  }
  0x3b   : > { %351 = vst.msk [vmem:[#allocation2 + $0x14] sm:$0xf] %vm270_vm3, %v349_v7  ;;  %v363_v12 = vsel %vm264_vm1, %v362_v1, %v361_v8  ;;  %v378_v13 = vrot.slane %v370_v9, 6  ;;  %v380_v14 = vrot.slane %v371_v10, 5  ;;  %vm443_vm6 = vcmask 388352   ;;  %s682_s5 = sshll.u32 %s1070_s10, 2 }
  0x3c   : > { %v385_v15 = vld [vmem:[#allocation2 + $0x8] sm:$0xff]  ;;  %v365_v16 = vsel %vm267_vm2, %v364_v4, %v363_v12  ;;  %v377_v17 = vsel %vm261_vm0, %v376_v11, %v368_v5  ;;  %vm448_vm7 = vcmask 523652   ;;  %vm454_vm8 = vcmask 650752   ;;  %v532_v37 = vld [vmem:[%s1233_s3] sm:$0xf]  ;;  %s689_s6 = sshll.u32 %s919_s18, 2 }
  0x3d   : > { %684 = vmatmul.msk.f32.vlgmr.msra.gmra.mxu2 %vm390_vm4, %v385_v15  ;;  %367 = vst.msk [vmem:[#allocation2 + $0x18] sm:$0xf] %vm270_vm3, %v365_v16  ;;  %v379_v18 = vsel %vm264_vm1, %v378_v13, %v377_v17  ;;  %vm459_vm9 = vcmask 786052   ;;  %v939_v39 = vmov 0   ;;  %vm465_vm10 = vcmask 913152   ;;  %s575_s21 = scalar_lea.hbm %s1234_s4, %s689_s6  ;;  %s251_s27 = scalar_lea.vmem [#allocation9], %s682_s5 }
  0x3e   : > { %v381_v19 = vsel %vm267_vm2, %v380_v14, %v379_v18  ;;  %780 = vset.pattern.permute.xlu0 %v939_v39  ;;  %vm470_vm11 = vcmask 1048452   ;;  %v529_v48 = vld [vmem:[%s1232_s2] sm:$0xf] }
  0x3f   : > { %383 = vst.msk [vmem:[#allocation2 + $0x1c] sm:$0xf] %vm270_vm3, %v381_v19 }
  0x42   : > { %v386_v20 = vld [vmem:[#allocation2 + $0x10] sm:$0xff] }
  0x45   : > { %685 = vmatmul.msk.f32.gmra.mxu2 %vm390_vm4, %v386_v20 }
  0x46   : > { %v387_v21 = vld [vmem:[#allocation2 + $0x18] sm:$0xff] }
  0x47   : > { %686 = vmatmul.msk.f32.vlgmr.msra.gmra.mxu3 %vm390_vm4, %v387_v21 }
  0xb7   : > { %v420_v22 = vpop.f32.mrf.mxu0 }
  0xb8   : > { %432 = vst.msk [vmem:[#allocation3] sm:$0xf] %vm270_vm3, %v420_v22  ;;  %434 = vrot.lane.b32.xlu2 %v420_v22, %s932_s1  ;;  %472 = vrot.lane.b32.xlu1 %v420_v22, %s933_s23 }
  0xb9   : > { %492 = vrot.lane.b32.xlu0 %v420_v22, %s934_s25 }
  0xc0   : > { %v423_v23 = vpop.f32.mrf.mxu2 }
  0xc1   : > { %477 = vrot.lane.b32.xlu2 %v423_v23, %s932_s1  ;;  %514 = vrot.lane.b32.xlu1 %v423_v23, %s933_s23 }
  0xc2   : > { %509 = vrot.lane.b32.xlu0 %v420_v22, %s935_s30 }
  0xc8   : > { %v426_v24 = vpop.f32.mrf.mxu2 }
  0xc9   : > { %519 = vrot.lane.b32.xlu2 %v426_v24, %s932_s1  ;;  %s577_s1 = sshll.u32 %s251_s27, 4  ;;  %s578_s1 = int_to_ptr.vmem [resolvable:$true] %s577_s1 }
  0xca   : > { %v429_v25 = vpop.f32.mrf.mxu3  ;;  %440 = vrot.lane.b32.xlu0 %v423_v23, %s936_s7 }
  0xcb   : > { %524 = vrot.lane.b32.xlu1 %v429_v25, %s937_s8 }
  0xd1   : > { %451 = vrot.lane.b32.xlu2 %v426_v24, %s938_s9 }
  0xd2   : > { %445 = vrot.lane.b32.xlu0 %v423_v23, %s937_s8 }
  0xd3   : > { %499 = vrot.lane.b32.xlu1 %v426_v24, %s936_s7 }
  0xd9   : > { %456 = vrot.lane.b32.xlu2 %v426_v24, %s935_s30 }
  0xda   : > { %504 = vrot.lane.b32.xlu0 %v429_v25, %s938_s9  ;;  %s861_s9 = scalar_lea.hbm %s1234_s4, 8 }
  0xdb   : > { %482 = vrot.lane.b32.xlu1 %v426_v24, %s937_s8 }
  0xe1   : > { %467 = vrot.lane.b32.xlu2 %v429_v25, %s933_s23  ;;  %s579_s23 = sshll.u32 %s575_s21, 4  ;;  %s580_s23 = int_to_ptr.hbm [resolvable:$true] %s579_s23 }
  0xe2   : > { %487 = vrot.lane.b32.xlu0 %v429_v25, %s935_s30  ;;  %s855_s30 = sshra.s32 %s580_s23, 4  ;;  %s856_s30 = int_to_ptr.hbm [resolvable:$true] %s855_s30 }
  0xe3   : > { %462 = vrot.lane.b32.xlu1 %v429_v25, %s934_s25  ;;  %s564_s25 = scalar_lea.sflag [#allocation6], %s1070_s10  ;;  %s857_s7 = scalar_lea.hbm %s856_s30, 4 }
  0xe4   : > { %p858_p1 = scmp.ne.s32.totalorder %s856_s30, %s857_s7  ;;  %p862_p10 = scmp.lt.s32.totalorder %s856_s30, %s1234_s4 }
  0xe5   : > { %p863_p12 = scmp.lt.s32.totalorder %s861_s9, %s857_s7 }
  0xe6   : > { %p859_p4 = pnand %p858_p1, %p1047_p5 }
  0xe7   : > { %p864_p13 = por %p863_p12, %p862_p10 }
  0xe8   : > { %p860_p8 = pneg %p859_p4 }
  0xea   : > { %535 = vperm.xlu0 %780, %v532_v37   ;;  %p865_p0 = pnand %p864_p13, %p860_p8 }
 0x112   : > { %v435_v26 = vpop.permute.xlu2 %434 }
 0x113   : > { %438 = vst.msk [vmem:[#allocation3 - $0x4] sm:$0xf0] %vm437_vm5, %v435_v26 }
 0x11b   : > { %v478_v27 = vpop.permute.xlu2 %477 }
 0x123   : > { %v520_v31 = vpop.permute.xlu2 %519 }
 0x12a   : > { %v473_v28 = vpop.permute.xlu1 %472 }
 0x12b   : > { %475 = vst.msk [vmem:[#allocation3 + $0x4] sm:$0xf] %vm270_vm3, %v473_v28  ;;  %v493_v29 = vpop.permute.xlu0 %492  ;;  %v452_v35 = vpop.permute.xlu2 %451 }
 0x12c   : > { %476 = vst.msk [vmem:[#allocation3] sm:$0xf0] %vm437_vm5, %v420_v22 }
 0x12d   : > { %495 = vst.msk [vmem:[#allocation3 + $0x8] sm:$0xf] %vm270_vm3, %v493_v29 }
 0x12e   : > { %496 = vst.msk [vmem:[#allocation3 + $0x4] sm:$0xf0] %vm437_vm5, %v473_v28 }
 0x12f   : > { %480 = vst.msk [vmem:[#allocation3 + $0x4] sm:$0xf] %vm443_vm6, %v478_v27 }
 0x130   : > { %497 = vst.msk [vmem:[#allocation3 + $0x8] sm:$0xf] %vm443_vm6, %v423_v23 }
 0x131   : > { %498 = vst.msk [vmem:[#allocation3 + $0x4] sm:$0xf0] %vm448_vm7, %v478_v27 }
 0x133   : > { %v515_v30 = vpop.permute.xlu1 %514  ;;  %v457_v40 = vpop.permute.xlu2 %456 }
 0x134   : > { %v510_v32 = vpop.permute.xlu0 %509 }
 0x135   : > { %512 = vst.msk [vmem:[#allocation3 + $0xc] sm:$0xf] %vm270_vm3, %v510_v32 }
 0x136   : > { %513 = vst.msk [vmem:[#allocation3 + $0x8] sm:$0xf0] %vm437_vm5, %v493_v29 }
 0x137   : > { %517 = vst.msk [vmem:[#allocation3 + $0xc] sm:$0xf] %vm443_vm6, %v515_v30 }
 0x138   : > { %518 = vst.msk [vmem:[#allocation3 + $0x8] sm:$0xf0] %vm448_vm7, %v423_v23 }
 0x139   : > { %522 = vst.msk [vmem:[#allocation3 + $0xc] sm:$0xf] %vm454_vm8, %v520_v31 }
 0x13b   : > { %v468_v45 = vpop.permute.xlu2 %467 }
 0x13c   : > { %v441_v33 = vpop.permute.xlu0 %440 }
 0x13d   : > { %v525_v34 = vpop.permute.xlu1 %524  ;;  %444 = vst.msk [vmem:[#allocation3] sm:$0xf] %vm443_vm6, %v441_v33 }
 0x13e   : > { %481 = vst.msk [vmem:[#allocation3] sm:$0xf0] %vm448_vm7, %v441_v33 }
 0x144   : > { %v446_v36 = vpop.permute.xlu0 %445 }
 0x145   : > { %v500_v38 = vpop.permute.xlu1 %499  ;;  %449 = vst.msk [vmem:[#allocation3 - $0x4] sm:$0xf0] %vm448_vm7, %v446_v36 }
 0x146   : > { %502 = vst.msk [vmem:[#allocation3 + $0x8] sm:$0xf] %vm454_vm8, %v500_v38 }
 0x147   : > { %523 = vst.msk [vmem:[#allocation3 + $0x8] sm:$0xf0] %vm459_vm9, %v500_v38 }
 0x148   : > { %455 = vst.msk [vmem:[#allocation3] sm:$0xf] %vm454_vm8, %v452_v35 }
 0x149   : > { %460 = vst.msk [vmem:[#allocation3 - $0x4] sm:$0xf0] %vm459_vm9, %v457_v40 }
 0x14a   : > { %527 = vst.msk [vmem:[#allocation3 + $0xc] sm:$0xf] %vm465_vm10, %v525_v34 }
 0x14c   : > { %v505_v41 = vpop.permute.xlu0 %504 }
 0x14d   : > { %v483_v42 = vpop.permute.xlu1 %482  ;;  %528 = vst.msk [vmem:[#allocation3 + $0x8] sm:$0xf0] %vm470_vm11, %v505_v41 }
 0x14e   : > { %485 = vst.msk [vmem:[#allocation3 + $0x4] sm:$0xf] %vm454_vm8, %v483_v42 }
 0x14f   : > { %503 = vst.msk [vmem:[#allocation3 + $0x4] sm:$0xf0] %vm459_vm9, %v483_v42 }
 0x150   : > { %486 = vst.msk [vmem:[#allocation3] sm:$0xf0] %vm459_vm9, %v452_v35 }
 0x151   : > { %507 = vst.msk [vmem:[#allocation3 + $0x8] sm:$0xf] %vm465_vm10, %v505_v41 }
 0x154   : > { %v488_v43 = vpop.permute.xlu0 %487 }
 0x155   : > { %v463_v44 = vpop.permute.xlu1 %462  ;;  %490 = vst.msk [vmem:[#allocation3 + $0x4] sm:$0xf] %vm465_vm10, %v488_v43 }
 0x156   : > { %466 = vst.msk [vmem:[#allocation3] sm:$0xf] %vm465_vm10, %v463_v44 }
 0x157   : > { %471 = vst.msk [vmem:[#allocation3 - $0x4] sm:$0xf0] %vm470_vm11, %v468_v45 }
 0x158   : > { %491 = vst.msk [vmem:[#allocation3] sm:$0xf0] %vm470_vm11, %v463_v44 }
 0x159   : > { %508 = vst.msk [vmem:[#allocation3 + $0x4] sm:$0xf0] %vm470_vm11, %v488_v43 }
 0x15c   : > { %v536_v49 = vpop.permute.xlu0 %535 }
 0x15f   : > { %v530_v47 = vld [vmem:[#allocation3] sm:$0xff] }
 0x160   : > { %v531_v46 = vld [vmem:[#allocation3 + $0x8] sm:$0xff] }
 0x161   : > { %555 = vmatpush.msra.mxu1 %v531_v46 }
 0x163   : > { %556 = vmatpush.msra.mxu1 %v530_v47 }
 0x164   : > { %687 = vmatmul.msk.f32.vlgmr.msra.gmra.mxu1 %vm390_vm4, %v529_v48 }
 0x1e1   : > { %v558_v50 = vpop.f32.mrf.mxu1 }
 0x1e2   : > { %v559_v51 = vadd.f32 %v558_v50, %v536_v49 }
 0x1e4   : > { %v561_v52 = vmax.f32 %v559_v51, 0.0 }
 0x1e6   : > { %562 = vst [vmem:[%s251_s27] sm:$0xf] %v561_v52 }
 0x1e7   : > { %868 = shalt.err (!%p865_p0)
}
 0x1e8   : > { %703 = dma.vmem_to_hbm [thread:$0]  (%p1047_p5), %s578_s1, 64, %s580_s23, %s564_s25  }
 0x1e9 PF: > { %s591_s10 = sand.u32 1, %s907_s15   ;;  %p714_p3 = pnand %p675_p11, %p1014_p6 }
 0x1ea   : > { %s592_s28 = scalar_lea.sflag [#allocation6], %s591_s10 }
 0x1eb   : > { %p715_p7 = pneg %p714_p3 }
 0x1ed   : > { %902 = dma.done.wait (%p715_p7), %s592_s28, 64  }
 0x1ee   : > { %904 = vsyncadd (%p715_p7), %s592_s28, 4294967232  ;;  %s21_s20 = sadd.s32 1, %s927_s20   ;;  %s1250_s12 = sld [smem:[#allocation13_spill]] }
 0x1ef   : > { %p18_p9 = scmp.ge.s32.totalorder %s21_s20, 4   ;;  %s1251_s15 = smov %s911_s16 }
 0x1f0   : > { %s1252_s16 = smov %s915_s17  ;;  %s1253_s17 = smov %s1056_s22 }
 0x1f1   : > { %s1254_s18 = smov %s923_s19  ;;  %20 = sbr.rel (!%p18_p9) target bundleno = 9 (0x9), region = 85 }
 0x1f4   : > { %s1255_s19 = smov %s1250_s12 }
 0x1f6   :  { %598 = vsyncpa [#allocation5], 1 }
 0x1f7   :  { %600 = vsyncpa [#allocation5 + $0x1], 1 }
 0x1f8   :  { %601 = vsyncpa [#allocation8], 1 }
 0x1f9   :  { %602 = vsyncpa [#allocation6], 1 }
 0x1fa   :  { %604 = vsyncpa [#allocation6 + $0x1], 1 }

</bundles_post_ra>
